<compile_context>
chip_gen: v7x
topology: tpu7x:2x2x1
jax: 0.10.0
libtpu: 0.0.40
codegen_flags: <defaults>
</compile_context>

<pallas_src>
import jax
import jax.numpy as jnp
from jax.experimental import pallas as pl
from jax.experimental.pallas import tpu as pltpu

FEAT = 200          # hidden size of the module
NUM_LABELS = 9      # len(TweetProcessor.get_labels())
# TODO(synk): NUM_LABELS depends on TweetProcessor.get_labels(); 9 is a stand-in.


def _round_up(x, m):
    return ((x + m - 1) // m) * m


def filtration_gate_kernel(mult_ref, text_ref,
                           wm_ref, bm_ref,          # mult_Linear
                           wt_ref,                  # text_Linear (no bias)
                           wv_ref, bv_ref,          # resv_Linear
                           wr_t_ref, wr_m_ref, br_ref,   # reshape Linear(400,1)
                           wo_text_ref, wo_resv_ref, bo_ref,  # output Linear(400,L)
                           out_ref):
    mult = mult_ref[...]      # (tm, 200)
    text = text_ref[...]      # (tm, 200)

    # mult_Linear / text_Linear (weights pre-transposed to (in, out))
    m = jnp.dot(mult, wm_ref[...], preferred_element_type=jnp.float32) + bm_ref[...]
    t = jnp.dot(text, wt_ref[...], preferred_element_type=jnp.float32)

    # Gate: sigmoid(cat([t, m])) -> Linear(400,1) -> sigmoid
    # Done as a VPU multiply + lane reduce instead of two N=1 MXU dots.
    sig_t = jax.nn.sigmoid(t)
    sig_m = jax.nn.sigmoid(m)
    g_logit = jnp.sum(sig_t * wr_t_ref[...] + sig_m * wr_m_ref[...],
                      axis=-1, keepdims=True) + br_ref[...]
    g = jax.nn.sigmoid(g_logit)                     # (tm, 1)

    # resv_Linear + tanh, gated (gate broadcast over the feature dim
    # == torch .repeat(1,1,200) then mul)
    r = jnp.tanh(jnp.dot(mult, wv_ref[...], preferred_element_type=jnp.float32)
                 + bv_ref[...])
    reserved = (g * r).astype(wo_resv_ref.dtype)    # (tm, 200)

    # output_Linear on cat([text_embedding, reserved]) split into two halves.
    out = (jnp.dot(text, wo_text_ref[...], preferred_element_type=jnp.float32)
           + jnp.dot(reserved, wo_resv_ref[...], preferred_element_type=jnp.float32)
           + bo_ref[...])
    out_ref[...] = out.astype(out_ref.dtype)


def filtration_gate_forward(mult_model, text_embedding, params, *,
                            tm=512, use_bf16=False):
    """mult_model, text_embedding: (B, S, 200) float32 -> (B, S, NUM_LABELS)."""
    B, S, F = mult_model.shape
    assert F == FEAT and text_embedding.shape == mult_model.shape
    M = B * S

    # Row tile: large to amortize per-step pipeline overhead, but clamped for
    # small problems; keep it a multiple of 8 (sublane) and pad M up to it.
    tm_eff = _round_up(min(tm, _round_up(M, 8)), 8)
    M_pad = _round_up(M, tm_eff)
    grid = (M_pad // tm_eff,)

    mult2d = mult_model.reshape(M, FEAT)
    text2d = text_embedding.reshape(M, FEAT)
    if M_pad != M:
        pad = M_pad - M
        mult2d = jnp.pad(mult2d, ((0, pad), (0, 0)))
        text2d = jnp.pad(text2d, ((0, pad), (0, 0)))

    stream_dtype = jnp.bfloat16 if use_bf16 else jnp.float32
    mult2d = mult2d.astype(stream_dtype)
    text2d = text2d.astype(stream_dtype)

    # Weights pre-transposed to (in, out) so the kernel computes x @ W.
    wm_T = params["wm"].T.astype(stream_dtype)        # (200, 200)
    wt_T = params["wt"].T.astype(stream_dtype)        # (200, 200)
    wv_T = params["wv"].T.astype(stream_dtype)        # (200, 200)
    bm = params["bm"].reshape(1, FEAT).astype(jnp.float32)
    bv = params["bv"].reshape(1, FEAT).astype(jnp.float32)
    # reshape: Linear(400, 1); first 200 cols act on sigmoid(t), last 200 on sigmoid(m)
    wr_t = params["wr"][:, :FEAT].reshape(1, FEAT).astype(jnp.float32)
    wr_m = params["wr"][:, FEAT:].reshape(1, FEAT).astype(jnp.float32)
    br = params["br"].reshape(1, 1).astype(jnp.float32)
    # output_Linear: Linear(400, L); first 200 cols act on text_embedding, last 200 on g*r
    wo_text = params["wo"][:, :FEAT].T.astype(stream_dtype)   # (200, L)
    wo_resv = params["wo"][:, FEAT:].T.astype(stream_dtype)   # (200, L)
    bo = params["bo"].reshape(1, NUM_LABELS).astype(jnp.float32)

    rows = lambda i: (i, 0)
    full = lambda i: (0, 0)

    out = pl.pallas_call(
        filtration_gate_kernel,
        out_shape=jax.ShapeDtypeStruct((M_pad, NUM_LABELS), jnp.float32),
        grid_spec=pltpu.PrefetchScalarGridSpec(
            num_scalar_prefetch=0,
            grid=grid,
            in_specs=[
                pl.BlockSpec((tm_eff, FEAT), rows),       # mult rows
                pl.BlockSpec((tm_eff, FEAT), rows),       # text rows
                pl.BlockSpec((FEAT, FEAT), full),         # Wm^T
                pl.BlockSpec((1, FEAT), full),            # bm
                pl.BlockSpec((FEAT, FEAT), full),         # Wt^T
                pl.BlockSpec((FEAT, FEAT), full),         # Wv^T
                pl.BlockSpec((1, FEAT), full),            # bv
                pl.BlockSpec((1, FEAT), full),            # wr_t
                pl.BlockSpec((1, FEAT), full),            # wr_m
                pl.BlockSpec((1, 1), full),               # br
                pl.BlockSpec((FEAT, NUM_LABELS), full),   # Wo_text^T
                pl.BlockSpec((FEAT, NUM_LABELS), full),   # Wo_resv^T
                pl.BlockSpec((1, NUM_LABELS), full),      # bo
            ],
            out_specs=pl.BlockSpec((tm_eff, NUM_LABELS), rows),
        ),
        compiler_params=pltpu.CompilerParams(
            dimension_semantics=("parallel",),   # shards row tiles across TCs on v7x
        ),
    )(mult2d, text2d, wm_T, bm, wt_T, wv_T, bv, wr_t, wr_m, br,
      wo_text, wo_resv, bo)

    return out[:M].reshape(B, S, NUM_LABELS)


def init_params(key):
    """Deterministic synthetic parameters matching the nn.Module shapes."""
    ks = jax.random.split(key, 9)
    s200 = 1.0 / jnp.sqrt(FEAT)
    s400 = 1.0 / jnp.sqrt(2.0 * FEAT)
    return {
        "wm": jax.random.uniform(ks[0], (FEAT, FEAT), jnp.float32, -s200, s200),
        "bm": jax.random.uniform(ks[1], (FEAT,), jnp.float32, -s200, s200),
        "wt": jax.random.uniform(ks[2], (FEAT, FEAT), jnp.float32, -s200, s200),
        "wv": jax.random.uniform(ks[3], (FEAT, FEAT), jnp.float32, -s200, s200),
        "bv": jax.random.uniform(ks[4], (FEAT,), jnp.float32, -s200, s200),
        "wr": jax.random.uniform(ks[5], (1, 2 * FEAT), jnp.float32, -s400, s400),
        "br": jax.random.uniform(ks[6], (1,), jnp.float32, -s400, s400),
        "wo": jax.random.uniform(ks[7], (NUM_LABELS, 2 * FEAT), jnp.float32, -s400, s400),
        "bo": jax.random.uniform(ks[8], (NUM_LABELS,), jnp.float32, -s400, s400),
    }


def filtration_gate_reference(mult_model, text_embedding, p):
    """Pure-JAX reference mirroring the PyTorch forward exactly."""
    m = mult_model @ p["wm"].T + p["bm"]
    t = text_embedding @ p["wt"].T
    concat_feature = jnp.concatenate([t, m], axis=-1)
    gate = jax.nn.sigmoid(concat_feature)
    gate = gate @ p["wr"].T + p["br"]
    gate = jax.nn.sigmoid(gate)                       # (B, S, 1)
    gate = jnp.repeat(gate, FEAT, axis=-1)            # (B, S, 200)
    r = jnp.tanh(mult_model @ p["wv"].T + p["bv"])
    reserved = gate * r
    out_cat = jnp.concatenate([text_embedding, reserved], axis=-1)
    return out_cat @ p["wo"].T + p["bo"]


if __name__ == "__main__":
    key = jax.random.PRNGKey(0)
    kp, km, kt = jax.random.split(key, 3)

    B, S = 2, 8
    params = init_params(kp)
    mult_model = jax.random.normal(km, (B, S, FEAT), jnp.float32)
    text_embedding = jax.random.normal(kt, (B, S, FEAT), jnp.float32)

    # f32 path: exact match to the reference
    out = filtration_gate_forward(mult_model, text_embedding, params)
    out = jax.block_until_ready(out)
    ref = filtration_gate_reference(mult_model, text_embedding, params)
    assert out.shape == (B, S, NUM_LABELS)
    assert jnp.allclose(out, ref, atol=1e-5, rtol=1e-5), \
        f"f32 max err {jnp.max(jnp.abs(out - ref))}"

    # bf16 streaming path (v6e/v7x memory-bound optimization): looser tolerance
    out_bf16 = jax.block_until_ready(
        filtration_gate_forward(mult_model, text_embedding, params, use_bf16=True))
    assert jnp.allclose(out_bf16, ref, atol=5e-2, rtol=5e-2), \
        f"bf16 max err {jnp.max(jnp.abs(out_bf16 - ref))}"

    print("KERNEL_OK")
</pallas_src>

<mosaic_0001>
module attributes {stable_mosaic.version = 11 : i64} {
  func.func @filtration_gate_kernel(%arg0: i32, %arg1: memref<16x200xf32, #tpu.memory_space<vmem>>, %arg2: memref<16x200xf32, #tpu.memory_space<vmem>>, %arg3: memref<200x200xf32, #tpu.memory_space<vmem>>, %arg4: memref<1x200xf32, #tpu.memory_space<vmem>>, %arg5: memref<200x200xf32, #tpu.memory_space<vmem>>, %arg6: memref<200x200xf32, #tpu.memory_space<vmem>>, %arg7: memref<1x200xf32, #tpu.memory_space<vmem>>, %arg8: memref<1x200xf32, #tpu.memory_space<vmem>>, %arg9: memref<1x200xf32, #tpu.memory_space<vmem>>, %arg10: memref<1x1xf32, #tpu.memory_space<vmem>>, %arg11: memref<200x9xf32, #tpu.memory_space<vmem>>, %arg12: memref<200x9xf32, #tpu.memory_space<vmem>>, %arg13: memref<1x9xf32, #tpu.memory_space<vmem>>, %arg14: memref<16x9xf32, #tpu.memory_space<vmem>>) attributes {dimension_semantics = [#tpu.dimension_semantics<parallel>], iteration_bounds = array<i64: 1>, scalar_prefetch = 0 : i64, scratch_operands = 0 : i64, tpu.core_type = #tpu.core_type<tc>, window_params = [{transform_indices = @transform_0, window_bounds = array<i64: 16, 200>}, {transform_indices = @transform_1, window_bounds = array<i64: 16, 200>}, {pipeline_mode = #tpu.pipeline_mode<synchronous>, transform_indices = @transform_2, window_bounds = array<i64: 200, 200>}, {pipeline_mode = #tpu.pipeline_mode<synchronous>, transform_indices = @transform_3, window_bounds = array<i64: 1, 200>}, {pipeline_mode = #tpu.pipeline_mode<synchronous>, transform_indices = @transform_4, window_bounds = array<i64: 200, 200>}, {pipeline_mode = #tpu.pipeline_mode<synchronous>, transform_indices = @transform_5, window_bounds = array<i64: 200, 200>}, {pipeline_mode = #tpu.pipeline_mode<synchronous>, transform_indices = @transform_6, window_bounds = array<i64: 1, 200>}, {pipeline_mode = #tpu.pipeline_mode<synchronous>, transform_indices = @transform_7, window_bounds = array<i64: 1, 200>}, {pipeline_mode = #tpu.pipeline_mode<synchronous>, transform_indices = @transform_8, window_bounds = array<i64: 1, 200>}, {pipeline_mode = #tpu.pipeline_mode<synchronous>, transform_indices = @transform_9, window_bounds = array<i64: 1, 1>}, {pipeline_mode = #tpu.pipeline_mode<synchronous>, transform_indices = @transform_10, window_bounds = array<i64: 200, 9>}, {pipeline_mode = #tpu.pipeline_mode<synchronous>, transform_indices = @transform_11, window_bounds = array<i64: 200, 9>}, {pipeline_mode = #tpu.pipeline_mode<synchronous>, transform_indices = @transform_12, window_bounds = array<i64: 1, 9>}, {transform_indices = @transform_13, window_bounds = array<i64: 16, 9>}]} {
    %c0 = arith.constant 0 : index
    %c0_0 = arith.constant 0 : index
    %0 = vector.load %arg1[%c0, %c0_0] : memref<16x200xf32, #tpu.memory_space<vmem>>, vector<16x200xf32>
    %c0_1 = arith.constant 0 : index
    %c0_2 = arith.constant 0 : index
    %1 = vector.load %arg2[%c0_1, %c0_2] : memref<16x200xf32, #tpu.memory_space<vmem>>, vector<16x200xf32>
    %c0_3 = arith.constant 0 : index
    %c0_4 = arith.constant 0 : index
    %2 = vector.load %arg3[%c0_3, %c0_4] : memref<200x200xf32, #tpu.memory_space<vmem>>, vector<200x200xf32>
    %cst = arith.constant dense<0.000000e+00> : vector<16x200xf32>
    %3 = tpu.matmul %0, %2, %cst {dimension_numbers = #tpu.dot_dimension_numbers<[1], [0], [0], [1], [0, 0, 1, 1], [], []>} : vector<16x200xf32>, vector<200x200xf32>, vector<16x200xf32> -> vector<16x200xf32>
    %c0_5 = arith.constant 0 : index
    %c0_6 = arith.constant 0 : index
    %4 = vector.load %arg4[%c0_5, %c0_6] : memref<1x200xf32, #tpu.memory_space<vmem>>, vector<1x200xf32>
    %5 = vector.broadcast %4 : vector<1x200xf32> to vector<16x200xf32>
    %6 = arith.addf %3, %5 : vector<16x200xf32>
    %c0_7 = arith.constant 0 : index
    %c0_8 = arith.constant 0 : index
    %7 = vector.load %arg5[%c0_7, %c0_8] : memref<200x200xf32, #tpu.memory_space<vmem>>, vector<200x200xf32>
    %cst_9 = arith.constant dense<0.000000e+00> : vector<16x200xf32>
    %8 = tpu.matmul %1, %7, %cst_9 {dimension_numbers = #tpu.dot_dimension_numbers<[1], [0], [0], [1], [0, 0, 1, 1], [], []>} : vector<16x200xf32>, vector<200x200xf32>, vector<16x200xf32> -> vector<16x200xf32>
    %9 = arith.negf %8 : vector<16x200xf32>
    %10 = math.exp %9 : vector<16x200xf32>
    %cst_10 = arith.constant 1.000000e+00 : f32
    %11 = vector.broadcast %cst_10 : f32 to vector<16x200xf32>
    %12 = arith.addf %11, %10 : vector<16x200xf32>
    %13 = arith.divf %11, %12 : vector<16x200xf32>
    %14 = arith.negf %6 : vector<16x200xf32>
    %15 = math.exp %14 : vector<16x200xf32>
    %cst_11 = arith.constant 1.000000e+00 : f32
    %16 = vector.broadcast %cst_11 : f32 to vector<16x200xf32>
    %17 = arith.addf %16, %15 : vector<16x200xf32>
    %18 = arith.divf %16, %17 : vector<16x200xf32>
    %c0_12 = arith.constant 0 : index
    %c0_13 = arith.constant 0 : index
    %19 = vector.load %arg8[%c0_12, %c0_13] : memref<1x200xf32, #tpu.memory_space<vmem>>, vector<1x200xf32>
    %20 = vector.broadcast %19 : vector<1x200xf32> to vector<16x200xf32>
    %21 = arith.mulf %13, %20 : vector<16x200xf32>
    %c0_14 = arith.constant 0 : index
    %c0_15 = arith.constant 0 : index
    %22 = vector.load %arg9[%c0_14, %c0_15] : memref<1x200xf32, #tpu.memory_space<vmem>>, vector<1x200xf32>
    %23 = vector.broadcast %22 : vector<1x200xf32> to vector<16x200xf32>
    %24 = arith.mulf %18, %23 : vector<16x200xf32>
    %25 = arith.addf %21, %24 : vector<16x200xf32>
    %cst_16 = arith.constant dense<0.000000e+00> : vector<16xf32>
    %26 = vector.multi_reduction <add>, %25, %cst_16 [1] : vector<16x200xf32> to vector<16xf32>
    %27 = vector.shape_cast %26 : vector<16xf32> to vector<16x1xf32>
    %c0_17 = arith.constant 0 : index
    %c0_18 = arith.constant 0 : index
    %28 = vector.load %arg10[%c0_17, %c0_18] : memref<1x1xf32, #tpu.memory_space<vmem>>, vector<1x1xf32>
    %29 = vector.broadcast %28 : vector<1x1xf32> to vector<16x1xf32>
    %30 = arith.addf %27, %29 : vector<16x1xf32>
    %31 = arith.negf %30 : vector<16x1xf32>
    %32 = math.exp %31 : vector<16x1xf32>
    %cst_19 = arith.constant 1.000000e+00 : f32
    %33 = vector.broadcast %cst_19 : f32 to vector<16x1xf32>
    %34 = arith.addf %33, %32 : vector<16x1xf32>
    %35 = arith.divf %33, %34 : vector<16x1xf32>
    %c0_20 = arith.constant 0 : index
    %c0_21 = arith.constant 0 : index
    %36 = vector.load %arg6[%c0_20, %c0_21] : memref<200x200xf32, #tpu.memory_space<vmem>>, vector<200x200xf32>
    %cst_22 = arith.constant dense<0.000000e+00> : vector<16x200xf32>
    %37 = tpu.matmul %0, %36, %cst_22 {dimension_numbers = #tpu.dot_dimension_numbers<[1], [0], [0], [1], [0, 0, 1, 1], [], []>} : vector<16x200xf32>, vector<200x200xf32>, vector<16x200xf32> -> vector<16x200xf32>
    %c0_23 = arith.constant 0 : index
    %c0_24 = arith.constant 0 : index
    %38 = vector.load %arg7[%c0_23, %c0_24] : memref<1x200xf32, #tpu.memory_space<vmem>>, vector<1x200xf32>
    %39 = vector.broadcast %38 : vector<1x200xf32> to vector<16x200xf32>
    %40 = arith.addf %37, %39 : vector<16x200xf32>
    %41 = math.tanh %40 : vector<16x200xf32>
    %42 = vector.broadcast %35 : vector<16x1xf32> to vector<16x200xf32>
    %43 = arith.mulf %42, %41 : vector<16x200xf32>
    %c0_25 = arith.constant 0 : index
    %c0_26 = arith.constant 0 : index
    %44 = vector.load %arg11[%c0_25, %c0_26] : memref<200x9xf32, #tpu.memory_space<vmem>>, vector<200x9xf32>
    %cst_27 = arith.constant dense<0.000000e+00> : vector<16x9xf32>
    %45 = tpu.matmul %1, %44, %cst_27 {dimension_numbers = #tpu.dot_dimension_numbers<[1], [0], [0], [1], [0, 0, 1, 1], [], []>} : vector<16x200xf32>, vector<200x9xf32>, vector<16x9xf32> -> vector<16x9xf32>
    %c0_28 = arith.constant 0 : index
    %c0_29 = arith.constant 0 : index
    %46 = vector.load %arg12[%c0_28, %c0_29] : memref<200x9xf32, #tpu.memory_space<vmem>>, vector<200x9xf32>
    %cst_30 = arith.constant dense<0.000000e+00> : vector<16x9xf32>
    %47 = tpu.matmul %43, %46, %cst_30 {dimension_numbers = #tpu.dot_dimension_numbers<[1], [0], [0], [1], [0, 0, 1, 1], [], []>} : vector<16x200xf32>, vector<200x9xf32>, vector<16x9xf32> -> vector<16x9xf32>
    %48 = arith.addf %45, %47 : vector<16x9xf32>
    %c0_31 = arith.constant 0 : index
    %c0_32 = arith.constant 0 : index
    %49 = vector.load %arg13[%c0_31, %c0_32] : memref<1x9xf32, #tpu.memory_space<vmem>>, vector<1x9xf32>
    %50 = vector.broadcast %49 : vector<1x9xf32> to vector<16x9xf32>
    %51 = arith.addf %48, %50 : vector<16x9xf32>
    %c0_33 = arith.constant 0 : index
    %c0_34 = arith.constant 0 : index
    %52 = vector.load %arg14[%c0_33, %c0_34] : memref<16x9xf32, #tpu.memory_space<vmem>>, vector<16x9xf32>
    tpu.vector_store %arg14[%c0_33, %c0_34], %51 {strides = array<i32>} : memref<16x9xf32, #tpu.memory_space<vmem>>, vector<16x9xf32>,
    return
  }
  func.func @transform_0(%arg0: i32) -> (i32, i32) {
    %c0_i32 = arith.constant 0 : i32
    %c0_i32_0 = arith.constant 0 : i32
    return %arg0, %c0_i32 : i32, i32
  }
  func.func @transform_1(%arg0: i32) -> (i32, i32) {
    %c0_i32 = arith.constant 0 : i32
    %c0_i32_0 = arith.constant 0 : i32
    return %arg0, %c0_i32 : i32, i32
  }
  func.func @transform_2(%arg0: i32) -> (i32, i32) {
    %c0_i32 = arith.constant 0 : i32
    %c0_i32_0 = arith.constant 0 : i32
    %c0_i32_1 = arith.constant 0 : i32
    return %c0_i32, %c0_i32_0 : i32, i32
  }
  func.func @transform_3(%arg0: i32) -> (i32, i32) {
    %c0_i32 = arith.constant 0 : i32
    %c0_i32_0 = arith.constant 0 : i32
    %c0_i32_1 = arith.constant 0 : i32
    return %c0_i32, %c0_i32_0 : i32, i32
  }
  func.func @transform_4(%arg0: i32) -> (i32, i32) {
    %c0_i32 = arith.constant 0 : i32
    %c0_i32_0 = arith.constant 0 : i32
    %c0_i32_1 = arith.constant 0 : i32
    return %c0_i32, %c0_i32_0 : i32, i32
  }
  func.func @transform_5(%arg0: i32) -> (i32, i32) {
    %c0_i32 = arith.constant 0 : i32
    %c0_i32_0 = arith.constant 0 : i32
    %c0_i32_1 = arith.constant 0 : i32
    return %c0_i32, %c0_i32_0 : i32, i32
  }
  func.func @transform_6(%arg0: i32) -> (i32, i32) {
    %c0_i32 = arith.constant 0 : i32
    %c0_i32_0 = arith.constant 0 : i32
    %c0_i32_1 = arith.constant 0 : i32
    return %c0_i32, %c0_i32_0 : i32, i32
  }
  func.func @transform_7(%arg0: i32) -> (i32, i32) {
    %c0_i32 = arith.constant 0 : i32
    %c0_i32_0 = arith.constant 0 : i32
    %c0_i32_1 = arith.constant 0 : i32
    return %c0_i32, %c0_i32_0 : i32, i32
  }
  func.func @transform_8(%arg0: i32) -> (i32, i32) {
    %c0_i32 = arith.constant 0 : i32
    %c0_i32_0 = arith.constant 0 : i32
    %c0_i32_1 = arith.constant 0 : i32
    return %c0_i32, %c0_i32_0 : i32, i32
  }
  func.func @transform_9(%arg0: i32) -> (i32, i32) {
    %c0_i32 = arith.constant 0 : i32
    %c0_i32_0 = arith.constant 0 : i32
    %c0_i32_1 = arith.constant 0 : i32
    return %c0_i32, %c0_i32_0 : i32, i32
  }
  func.func @transform_10(%arg0: i32) -> (i32, i32) {
    %c0_i32 = arith.constant 0 : i32
    %c0_i32_0 = arith.constant 0 : i32
    %c0_i32_1 = arith.constant 0 : i32
    return %c0_i32, %c0_i32_0 : i32, i32
  }
  func.func @transform_11(%arg0: i32) -> (i32, i32) {
    %c0_i32 = arith.constant 0 : i32
    %c0_i32_0 = arith.constant 0 : i32
    %c0_i32_1 = arith.constant 0 : i32
    return %c0_i32, %c0_i32_0 : i32, i32
  }
  func.func @transform_12(%arg0: i32) -> (i32, i32) {
    %c0_i32 = arith.constant 0 : i32
    %c0_i32_0 = arith.constant 0 : i32
    %c0_i32_1 = arith.constant 0 : i32
    return %c0_i32, %c0_i32_0 : i32, i32
  }
  func.func @transform_13(%arg0: i32) -> (i32, i32) {
    %c0_i32 = arith.constant 0 : i32
    %c0_i32_0 = arith.constant 0 : i32
    return %arg0, %c0_i32 : i32, i32
  }
}

</mosaic_0001>

<bundles_post_ra>
// kernel: tpu_custom_call.1
= control target key start
LH: loop header
LB: loop body
LE: loop exit
PB: predicated region body
PF: predicated region fallthrough
CT: control target
= control target key end

     0   :  { %s2007_s0 = inlined_call_operand.vmem [shape: f32[16,200], index: 0, kind: input, shape index: {}]   ;;  %s2008_s1 = inlined_call_operand.hbm [shape: f32[16,200], index: 1, kind: input, shape index: {}]   ;;  %s2009_s2 = inlined_call_operand.vmem [shape: f32[200,200], index: 2, kind: input, shape index: {}]   ;;  %s2010_s3 = inlined_call_operand.vmem [shape: f32[1,200], index: 3, kind: input, shape index: {}]   ;;  %s2011_s4 = inlined_call_operand.hbm [shape: f32[200,200], index: 4, kind: input, shape index: {}]   ;;  %s2012_s5 = inlined_call_operand.hbm [shape: f32[200,200], index: 5, kind: input, shape index: {}]   ;;  %s2013_s6 = inlined_call_operand.vmem [shape: f32[1,200], index: 6, kind: input, shape index: {}]   ;;  %s2014_s7 = inlined_call_operand.hbm [shape: f32[1,200], index: 7, kind: input, shape index: {}]   ;;  %s2015_s8 = inlined_call_operand.hbm [shape: f32[1,200], index: 8, kind: input, shape index: {}]   ;;  %s2016_s9 = inlined_call_operand.<no memory space> [shape: f32[1,1], index: 9, kind: input, shape index: {}]   ;;  %s2017_s10 = inlined_call_operand.vmem [shape: f32[200,9], index: 10, kind: input, shape index: {}]   ;;  %s2018_s11 = inlined_call_operand.vmem [shape: f32[200,9], index: 11, kind: input, shape index: {}]   ;;  %s2019_s12 = inlined_call_operand.vmem [shape: f32[1,9], index: 12, kind: input, shape index: {}]   ;;  %s2020_s13 = inlined_call_operand.hbm [shape: f32[16,9], index: 13, kind: output, shape index: {}]  }
   0x1   :  { %v18_v0 = vstv %s2016_s9 }
   0x2   :  { %19 = vst [vmem:[#allocation2] sm:$0x1] %v18_v0 }
   0x3   :  { %20 = vsyncpa [#allocation4], 0 }
   0x4   :  { %21 = vsyncpa [#allocation7], 0 }
   0x5   :  { %22 = vsyncpa [#allocation10], 0 }
   0x6   :  { %23 = vsyncpa [#allocation5], 0  ;;  %s1372_s27 = smov [#allocation6]   ;;  %s1373_s29 = smov [#allocation9]  }
   0x7   :  { %s47_s28 = sshll.u32 %s1372_s27, 4  ;;  %s74_s30 = sshll.u32 %s1373_s29, 4  ;;  %s48_s28 = int_to_ptr.vmem [resolvable:$true] %s47_s28  ;;  %s75_s30 = int_to_ptr.vmem [resolvable:$true] %s74_s30 }
   0x8   :  { %s1232_s16 = scalar_lea.hbm %s2011_s4, 6400 }
   0x9   :  { %p1233_p0 = scmp.ne.s32.totalorder %s2011_s4, %s1232_s16  ;;  %p1236_p1 = scmp.lt.u32.totalorder %s1232_s16, %s2011_s4 }
   0xb   :  { %p1238_p2 = pnand %p1236_p1, %p1233_p0 }
   0xd   :  { %1241 = shalt.err (!%p1238_p2)
}
   0xe   :  { %s1242_s20 = scalar_lea.vmem %s48_s28, 6400  ;;  %p1247_p4 = scmp.lt.s32.totalorder %s48_s28, %s48_s28 }
   0xf   :  { %p1243_p3 = scmp.ne.s32.totalorder %s48_s28, %s1242_s20  ;;  %p1248_p5 = scmp.lt.s32.totalorder %s1242_s20, %s1242_s20 }
  0x11   :  { %p1249_p6 = por %p1248_p5, %p1247_p4 }
  0x13   :  { %p1250_p7 = pnand %p1249_p6, %p1243_p3 }
  0x15   :  { %1253 = shalt.err (!%p1250_p7)
}
  0x16   :  { %s1374_s21 = smov 256   ;;  %s1375_s22 = smov 16  }
  0x17   :  { %53 = dma.hbm_to_vmem [thread:$0]  %s2011_s4, 6400, %s48_s28, [#allocation7], %s1374_s21, %s1374_s21, %s1375_s22  }
  0x18   :  { %s1254_s27 = scalar_lea.hbm %s2014_s7, 32 }
  0x19   :  { %p1255_p8 = scmp.ne.s32.totalorder %s2014_s7, %s1254_s27  ;;  %p1258_p9 = scmp.lt.u32.totalorder %s1254_s27, %s2014_s7 }
  0x1b   :  { %p1260_p10 = pnand %p1258_p9, %p1255_p8 }
  0x1d   :  { %1263 = shalt.err (!%p1260_p10)
}
  0x1e   :  { %s1264_s17 = scalar_lea.vmem %s75_s30, 32  ;;  %p1269_p12 = scmp.lt.s32.totalorder %s75_s30, %s75_s30 }
  0x1f   :  { %p1265_p11 = scmp.ne.s32.totalorder %s75_s30, %s1264_s17  ;;  %p1270_p13 = scmp.lt.s32.totalorder %s1264_s17, %s1264_s17 }
  0x21   :  { %p1271_p0 = por %p1270_p13, %p1269_p12 }
  0x23   :  { %p1272_p1 = pnand %p1271_p0, %p1265_p11 }
  0x25   :  { %1275 = shalt.err (!%p1272_p1)
}
  0x26   :  { %77 = dma.hbm_to_vmem [thread:$0]  %s2014_s7, 32, %s75_s30, [#allocation10]  }
  0x27   :  { %s1376_s18 = smov [#allocation3]   ;;  %s1377_s19 = smov [#allocation8]  }
  0x28   :  { %s31_s9 = sshll.u32 %s1376_s18, 4  ;;  %s59_s20 = sshll.u32 %s1377_s19, 4  ;;  %s32_s9 = int_to_ptr.vmem [resolvable:$true] %s31_s9  ;;  %s1485_s20 = int_to_ptr.vmem [resolvable:$true] %s59_s20 }
  0x29   :  { %s1276_s25 = scalar_lea.hbm %s2008_s1, 512 }
  0x2a   :  { %p1277_p2 = scmp.ne.s32.totalorder %s2008_s1, %s1276_s25  ;;  %p1280_p3 = scmp.lt.u32.totalorder %s1276_s25, %s2008_s1 }
  0x2c   :  { %p1282_p4 = pnand %p1280_p3, %p1277_p2 }
  0x2e   :  { %1285 = shalt.err (!%p1282_p4)
}
  0x2f   :  { %s1286_s7 = scalar_lea.vmem %s32_s9, 512  ;;  %p1291_p6 = scmp.lt.s32.totalorder %s32_s9, %s32_s9 }
  0x30   :  { %p1287_p5 = scmp.ne.s32.totalorder %s32_s9, %s1286_s7  ;;  %p1292_p7 = scmp.lt.s32.totalorder %s1286_s7, %s1286_s7 }
  0x32   :  { %p1293_p8 = por %p1292_p7, %p1291_p6 }
  0x34   :  { %p1294_p9 = pnand %p1293_p8, %p1287_p5 }
  0x36   :  { %1297 = shalt.err (!%p1294_p9)
}
  0x37   :  { %37 = dma.hbm_to_vmem [thread:$0]  %s2008_s1, 512, %s32_s9, [#allocation4], %s1374_s21, %s1374_s21, %s1375_s22  }
  0x38   :  { %s1298_s4 = scalar_lea.hbm %s2012_s5, 6400 }
  0x39   :  { %p1299_p10 = scmp.ne.s32.totalorder %s2012_s5, %s1298_s4  ;;  %p1302_p11 = scmp.lt.u32.totalorder %s1298_s4, %s2012_s5 }
  0x3b   :  { %p1304_p12 = pnand %p1302_p11, %p1299_p10 }
  0x3d   :  { %1307 = shalt.err (!%p1304_p12)
}
  0x3e   :  { %s1308_s24 = scalar_lea.vmem %s1485_s20, 6400  ;;  %p1313_p0 = scmp.lt.s32.totalorder %s1485_s20, %s1485_s20 }
  0x3f   :  { %p1309_p13 = scmp.ne.s32.totalorder %s1485_s20, %s1308_s24  ;;  %p1314_p1 = scmp.lt.s32.totalorder %s1308_s24, %s1308_s24 }
  0x41   :  { %p1315_p2 = por %p1314_p1, %p1313_p0 }
  0x43   :  { %p1316_p3 = pnand %p1315_p2, %p1309_p13 }
  0x45   :  { %1319 = shalt.err (!%p1316_p3)
}
  0x46   :  { %65 = dma.hbm_to_vmem [thread:$0]  %s2012_s5, 6400, %s1485_s20, [#allocation7], %s1374_s21, %s1374_s21, %s1375_s22  }
  0x47   :  { %s1378_s25 = smov [#allocation11]   ;;  %s1320_s14 = scalar_lea.hbm %s2015_s8, 32 }
  0x48   :  { %s84_s26 = sshll.u32 %s1378_s25, 4  ;;  %p1321_p4 = scmp.ne.s32.totalorder %s2015_s8, %s1320_s14  ;;  %s85_s26 = int_to_ptr.vmem [resolvable:$true] %s84_s26 }
  0x49   :  { %p1324_p5 = scmp.lt.u32.totalorder %s1320_s14, %s2015_s8 }
  0x4b   :  { %p1326_p6 = pnand %p1324_p5, %p1321_p4 }
  0x4d   :  { %1329 = shalt.err (!%p1326_p6)
}
  0x4e   :  { %s1330_s17 = scalar_lea.vmem %s85_s26, 32  ;;  %p1335_p8 = scmp.lt.s32.totalorder %s85_s26, %s85_s26 }
  0x4f   :  { %p1331_p7 = scmp.ne.s32.totalorder %s85_s26, %s1330_s17  ;;  %p1336_p9 = scmp.lt.s32.totalorder %s1330_s17, %s1330_s17 }
  0x51   :  { %p1337_p10 = por %p1336_p9, %p1335_p8 }
  0x53   :  { %p1338_p11 = pnand %p1337_p10, %p1331_p7 }
  0x55   :  { %1341 = shalt.err (!%p1338_p11)
}
  0x56   :  { %87 = dma.hbm_to_vmem [thread:$0]  %s2015_s8, 32, %s85_s26, [#allocation10]  }
  0x57   :  { %1364 = dma.done.wait [#allocation4], 512  }
  0x58   :  { %1365 = vsyncadd [#allocation4], 4294966784 }
  0x59   :  { %1366 = dma.done.wait [#allocation7], 12800  }
  0x5a   :  { %1367 = vsyncadd [#allocation7], 4294954496 }
  0x5b   :  { %1368 = dma.done.wait [#allocation10], 64  }
  0x5c   :  { %1369 = vsyncadd [#allocation10], 4294967232  ;;  %v120_v1 = vld [vmem:[%s2009_s2 + $0x8] sm:$0xff]  ;;  %v122_v2 = vld [vmem:[%s2009_s2 + $0x18] sm:$0xff]  ;;  %vm181_vm0 = vcmask 588800   ;;  %vm883_vm1 = vcmask 72704  }
  0x5d   :  { %v119_v3 = vld [vmem:[%s2009_s2] sm:$0xff]  ;;  %v927_v4 = vpack.c.bf16 %v122_v2, %v120_v1  ;;  %v121_v5 = vld [vmem:[%s2009_s2 + $0x10] sm:$0xff]  ;;  %v124_v12 = vld [vmem:[%s2009_s2 + $0x28] sm:$0xff] }
  0x5e   :  { %v266_v6 = vld [vmem:[#allocation6 + $0x8] sm:$0xff]  ;;  %v268_v7 = vld [vmem:[#allocation6 + $0x18] sm:$0xff]  ;;  %v929_v8 = vpack.c.bf16 %v121_v5, %v119_v3  ;;  %v265_v10 = vld [vmem:[#allocation6] sm:$0xff] }
  0x5f   :  { %v975_v9 = vpack.c.bf16 %v268_v7, %v266_v6  ;;  %v267_v11 = vld [vmem:[#allocation6 + $0x10] sm:$0xff]  ;;  %928 = vmatprep.subr.bf16.mxu0 %v927_v4  ;;  %v123_v15 = vld [vmem:[%s2009_s2 + $0x20] sm:$0xff]  ;;  %v270_v19 = vld [vmem:[#allocation6 + $0x28] sm:$0xff] }
  0x60   :  { %v977_v13 = vpack.c.bf16 %v267_v11, %v265_v10  ;;  %v126_v14 = vld [vmem:[%s2009_s2 + $0x38] sm:$0xff]  ;;  %v125_v16 = vld [vmem:[%s2009_s2 + $0x30] sm:$0xff]  ;;  %930 = vmatpush1.bf16.msra.mxu0 %v929_v8  ;;  %v269_v21 = vld [vmem:[#allocation6 + $0x20] sm:$0xff] }
  0x61   :  { %976 = vmatprep.subr.bf16.mxu1 %v975_v9  ;;  %v931_v17 = vpack.c.bf16 %v126_v14, %v124_v12  ;;  %v933_v18 = vpack.c.bf16 %v125_v16, %v123_v15  ;;  %v272_v20 = vld [vmem:[#allocation6 + $0x38] sm:$0xff]  ;;  %v271_v23 = vld [vmem:[#allocation6 + $0x30] sm:$0xff]  ;;  %v128_v24 = vld [vmem:[%s2009_s2 + $0x48] sm:$0xff] }
  0x62   :  { %978 = vmatpush1.bf16.msra.mxu1 %v977_v13  ;;  %v979_v22 = vpack.c.bf16 %v272_v20, %v270_v19  ;;  %v130_v25 = vld [vmem:[%s2009_s2 + $0x58] sm:$0xff]  ;;  %v981_v26 = vpack.c.bf16 %v271_v23, %v269_v21  ;;  %v127_v28 = vld [vmem:[%s2009_s2 + $0x40] sm:$0xff]  ;;  %v129_v29 = vld [vmem:[%s2009_s2 + $0x50] sm:$0xff] }
  0x63   :  { %932 = vmatprep.subr.bf16.mxu0 %v931_v17  ;;  %v935_v27 = vpack.c.bf16 %v130_v25, %v128_v24  ;;  %v274_v30 = vld [vmem:[#allocation6 + $0x48] sm:$0xff]  ;;  %v276_v31 = vld [vmem:[#allocation6 + $0x58] sm:$0xff]  ;;  %v273_v32 = vld [vmem:[#allocation6 + $0x40] sm:$0xff]  ;;  %v937_v34 = vpack.c.bf16 %v129_v29, %v127_v28 }
  0x64   :  { %980 = vmatprep.subr.bf16.mxu1 %v979_v22  ;;  %v275_v33 = vld [vmem:[#allocation6 + $0x50] sm:$0xff]  ;;  %934 = vmatpush1.bf16.msra.mxu0 %v933_v18  ;;  %v983_v35 = vpack.c.bf16 %v276_v31, %v274_v30  ;;  %v132_v36 = vld [vmem:[%s2009_s2 + $0x68] sm:$0xff]  ;;  %v131_v38 = vld [vmem:[%s2009_s2 + $0x60] sm:$0xff] }
  0x65   :  { %v134_v37 = vld [vmem:[%s2009_s2 + $0x78] sm:$0xff]  ;;  %936 = vmatprep.subr.bf16.mxu0 %v935_v27  ;;  %v985_v39 = vpack.c.bf16 %v275_v33, %v273_v32  ;;  %v133_v41 = vld [vmem:[%s2009_s2 + $0x70] sm:$0xff]  ;;  %v277_v45 = vld [vmem:[#allocation6 + $0x60] sm:$0xff] }
  0x66   :  { %982 = vmatpush1.bf16.msra.mxu1 %v981_v26  ;;  %v939_v40 = vpack.c.bf16 %v134_v37, %v132_v36  ;;  %v278_v42 = vld [vmem:[#allocation6 + $0x68] sm:$0xff]  ;;  %v280_v43 = vld [vmem:[#allocation6 + $0x78] sm:$0xff]  ;;  %v279_v46 = vld [vmem:[#allocation6 + $0x70] sm:$0xff]  ;;  %v941_v49 = vpack.c.bf16 %v133_v41, %v131_v38 }
  0x67   :  { %984 = vmatprep.subr.bf16.mxu1 %v983_v35  ;;  %v987_v44 = vpack.c.bf16 %v280_v43, %v278_v42  ;;  %v136_v47 = vld [vmem:[%s2009_s2 + $0x88] sm:$0xff]  ;;  %v138_v48 = vld [vmem:[%s2009_s2 + $0x98] sm:$0xff]  ;;  %v989_v52 = vpack.c.bf16 %v279_v46, %v277_v45  ;;  %v135_v54 = vld [vmem:[%s2009_s2 + $0x80] sm:$0xff] }
  0x68   :  { %938 = vmatpush1.bf16.msra.mxu0 %v937_v34  ;;  %v282_v50 = vld [vmem:[#allocation6 + $0x88] sm:$0xff]  ;;  %v284_v51 = vld [vmem:[#allocation6 + $0x98] sm:$0xff]  ;;  %v943_v53 = vpack.c.bf16 %v138_v48, %v136_v47  ;;  %v281_v56 = vld [vmem:[#allocation6 + $0x80] sm:$0xff] }
  0x69   :  { %940 = vmatprep.subr.bf16.mxu0 %v939_v40  ;;  %v137_v55 = vld [vmem:[%s2009_s2 + $0x90] sm:$0xff]  ;;  %v991_v57 = vpack.c.bf16 %v284_v51, %v282_v50  ;;  %v140_v59 = vld [vmem:[%s2009_s2 + $0xa8] sm:$0xff]  ;;  %v142_v60 = vld [vmem:[%s2009_s2 + $0xb8] sm:$0xff] }
  0x6a   :  { %986 = vmatpush1.bf16.msra.mxu1 %v985_v39  ;;  %v283_v58 = vld [vmem:[#allocation6 + $0x90] sm:$0xff]  ;;  %v286_v61 = vld [vmem:[#allocation6 + $0xa8] sm:$0xff]  ;;  %v288_v62 = vld [vmem:[#allocation6 + $0xb8] sm:$0xff]  ;;  %v945_v63 = vpack.c.bf16 %v137_v55, %v135_v54  ;;  %v947_v1 = vpack.c.bf16 %v142_v60, %v140_v59 }
  0x6b   :  { %988 = vmatprep.subr.bf16.mxu1 %v987_v44  ;;  %v993_v0 = vpack.c.bf16 %v283_v58, %v281_v56  ;;  %v139_v2 = vld [vmem:[%s2009_s2 + $0xa0] sm:$0xff]  ;;  %v141_v3 = vld [vmem:[%s2009_s2 + $0xb0] sm:$0xff]  ;;  %v995_v5 = vpack.c.bf16 %v288_v62, %v286_v61  ;;  %v144_v7 = vld [vmem:[%s2009_s2 + $0xc8] sm:$0xff] }
  0x6c   :  { %942 = vmatpush1.bf16.msra.mxu0 %v941_v49  ;;  %v285_v4 = vld [vmem:[#allocation6 + $0xa0] sm:$0xff]  ;;  %v287_v6 = vld [vmem:[#allocation6 + $0xb0] sm:$0xff]  ;;  %v290_v9 = vld [vmem:[#allocation6 + $0xc8] sm:$0xff]  ;;  %v949_v11 = vpack.c.bf16 %v141_v3, %v139_v2 }
  0x6d   :  { %944 = vmatprep.subr.bf16.mxu0 %v943_v53  ;;  %v146_v8 = vld [vmem:[%s2009_s2 + $0xd8] sm:$0xff]  ;;  %v997_v12 = vpack.c.bf16 %v287_v6, %v285_v4  ;;  %v143_v14 = vld [vmem:[%s2009_s2 + $0xc0] sm:$0xff]  ;;  %v145_v15 = vld [vmem:[%s2009_s2 + $0xd0] sm:$0xff] }
  0x6e   :  { %990 = vmatpush1.bf16.msra.mxu1 %v989_v52  ;;  %v292_v10 = vld [vmem:[#allocation6 + $0xd8] sm:$0xff]  ;;  %v951_v13 = vpack.c.bf16 %v146_v8, %v144_v7  ;;  %v289_v16 = vld [vmem:[#allocation6 + $0xc0] sm:$0xff]  ;;  %v291_v18 = vld [vmem:[#allocation6 + $0xd0] sm:$0xff]  ;;  %v953_v23 = vpack.c.bf16 %v145_v15, %v143_v14 }
  0x6f   :  { %992 = vmatprep.subr.bf16.mxu1 %v991_v57  ;;  %v999_v17 = vpack.c.bf16 %v292_v10, %v290_v9  ;;  %v148_v19 = vld [vmem:[%s2009_s2 + $0xe8] sm:$0xff]  ;;  %v150_v20 = vld [vmem:[%s2009_s2 + $0xf8] sm:$0xff]  ;;  %v1001_v24 = vpack.c.bf16 %v291_v18, %v289_v16  ;;  %v147_v26 = vld [vmem:[%s2009_s2 + $0xe0] sm:$0xff] }
  0x70   :  { %946 = vmatpush1.bf16.msra.mxu0 %v945_v63  ;;  %v294_v21 = vld [vmem:[#allocation6 + $0xe8] sm:$0xff]  ;;  %v296_v22 = vld [vmem:[#allocation6 + $0xf8] sm:$0xff]  ;;  %v955_v25 = vpack.c.bf16 %v150_v20, %v148_v19  ;;  %v293_v28 = vld [vmem:[#allocation6 + $0xe0] sm:$0xff] }
  0x71   :  { %948 = vmatprep.subr.bf16.mxu0 %v947_v1  ;;  %v149_v27 = vld [vmem:[%s2009_s2 + $0xf0] sm:$0xff]  ;;  %v1003_v29 = vpack.c.bf16 %v296_v22, %v294_v21  ;;  %v152_v31 = vld [vmem:[%s2009_s2 + $0x108] sm:$0xff]  ;;  %v154_v32 = vld [vmem:[%s2009_s2 + $0x118] sm:$0xff] }
  0x72   :  { %994 = vmatpush1.bf16.msra.mxu1 %v993_v0  ;;  %v295_v30 = vld [vmem:[#allocation6 + $0xf0] sm:$0xff]  ;;  %v298_v33 = vld [vmem:[#allocation6 + $0x108] sm:$0xff]  ;;  %v300_v34 = vld [vmem:[#allocation6 + $0x118] sm:$0xff]  ;;  %v957_v35 = vpack.c.bf16 %v149_v27, %v147_v26  ;;  %v959_v37 = vpack.c.bf16 %v154_v32, %v152_v31 }
  0x73   :  { %996 = vmatprep.subr.bf16.mxu1 %v995_v5  ;;  %v1005_v36 = vpack.c.bf16 %v295_v30, %v293_v28  ;;  %v151_v38 = vld [vmem:[%s2009_s2 + $0x100] sm:$0xff]  ;;  %v153_v39 = vld [vmem:[%s2009_s2 + $0x110] sm:$0xff]  ;;  %v1007_v41 = vpack.c.bf16 %v300_v34, %v298_v33  ;;  %v156_v43 = vld [vmem:[%s2009_s2 + $0x128] sm:$0xff] }
  0x74   :  { %950 = vmatpush1.bf16.msra.mxu0 %v949_v11  ;;  %v297_v40 = vld [vmem:[#allocation6 + $0x100] sm:$0xff]  ;;  %v299_v42 = vld [vmem:[#allocation6 + $0x110] sm:$0xff]  ;;  %v302_v45 = vld [vmem:[#allocation6 + $0x128] sm:$0xff]  ;;  %v961_v47 = vpack.c.bf16 %v153_v39, %v151_v38 }
  0x75   :  { %952 = vmatprep.subr.bf16.mxu0 %v951_v13  ;;  %v158_v44 = vld [vmem:[%s2009_s2 + $0x138] sm:$0xff]  ;;  %v155_v48 = vld [vmem:[%s2009_s2 + $0x120] sm:$0xff]  ;;  %v1654_v49 = vld [vmem:[%s2007_s0 + $0x8] sm:$0xff]  ;;  %v1009_v50 = vpack.c.bf16 %v299_v42, %v297_v40 }
  0x76   :  { %998 = vmatpush1.bf16.msra.mxu1 %v997_v12  ;;  %v304_v46 = vld [vmem:[#allocation6 + $0x138] sm:$0xff]  ;;  %v963_v51 = vpack.c.bf16 %v158_v44, %v156_v43  ;;  %v157_v52 = vld [vmem:[%s2009_s2 + $0x130] sm:$0xff]  ;;  %v301_v53 = vld [vmem:[#allocation6 + $0x120] sm:$0xff]  ;;  %905 = vmatprep.mubr.msk.f32.mxu0 %vm181_vm0, %v1654_v49 }
  0x77   :  { %1000 = vmatprep.subr.bf16.mxu1 %v999_v17  ;;  %v303_v54 = vld [vmem:[#allocation6 + $0x130] sm:$0xff]  ;;  %v1011_v55 = vpack.c.bf16 %v304_v46, %v302_v45  ;;  %v160_v56 = vld [vmem:[%s2009_s2 + $0x148] sm:$0xff]  ;;  %v308_v60 = vld [vmem:[#allocation6 + $0x158] sm:$0xff]  ;;  %v965_v61 = vpack.c.bf16 %v157_v52, %v155_v48 }
  0x78   :  { %954 = vmatpush1.bf16.msra.mxu0 %v953_v23  ;;  %v162_v57 = vld [vmem:[%s2009_s2 + $0x158] sm:$0xff]  ;;  %v1667_v58 = vld [vmem:[#allocation3 + $0x8] sm:$0xff]  ;;  %v1013_v62 = vpack.c.bf16 %v303_v54, %v301_v53  ;;  %v159_v0 = vld [vmem:[%s2009_s2 + $0x140] sm:$0xff] }
  0x79   :  { %956 = vmatprep.subr.bf16.mxu0 %v955_v25  ;;  %v306_v59 = vld [vmem:[#allocation6 + $0x148] sm:$0xff]  ;;  %907 = vmatprep.mubr.msk.f32.mxu1 %vm181_vm0, %v1667_v58  ;;  %v967_v63 = vpack.c.bf16 %v162_v57, %v160_v56  ;;  %v305_v2 = vld [vmem:[#allocation6 + $0x140] sm:$0xff]  ;;  %v307_v4 = vld [vmem:[#allocation6 + $0x150] sm:$0xff] }
  0x7a   :  { %1002 = vmatpush1.bf16.msra.mxu1 %v1001_v24  ;;  %v161_v1 = vld [vmem:[%s2009_s2 + $0x150] sm:$0xff]  ;;  %v1015_v3 = vpack.c.bf16 %v308_v60, %v306_v59  ;;  %v164_v5 = vld [vmem:[%s2009_s2 + $0x168] sm:$0xff]  ;;  %v166_v6 = vld [vmem:[%s2009_s2 + $0x178] sm:$0xff]  ;;  %v1017_v10 = vpack.c.bf16 %v307_v4, %v305_v2 }
  0x7b   :  { %1004 = vmatprep.subr.bf16.mxu1 %v1003_v29  ;;  %v310_v7 = vld [vmem:[#allocation6 + $0x168] sm:$0xff]  ;;  %v312_v8 = vld [vmem:[#allocation6 + $0x178] sm:$0xff]  ;;  %v969_v9 = vpack.c.bf16 %v161_v1, %v159_v0  ;;  %v971_v11 = vpack.c.bf16 %v166_v6, %v164_v5  ;;  %v309_v15 = vld [vmem:[#allocation6 + $0x160] sm:$0xff] }
  0x7c   :  { %958 = vmatpush1.bf16.msra.mxu0 %v957_v35  ;;  %v163_v12 = vld [vmem:[%s2009_s2 + $0x160] sm:$0xff]  ;;  %v165_v13 = vld [vmem:[%s2009_s2 + $0x170] sm:$0xff]  ;;  %v1019_v14 = vpack.c.bf16 %v312_v8, %v310_v7  ;;  %v168_v19 = vld [vmem:[%s2009_s2 + $0x188] sm:$0xff] }
  0x7d   :  { %960 = vmatprep.subr.bf16.mxu0 %v959_v37  ;;  %v311_v16 = vld [vmem:[#allocation6 + $0x170] sm:$0xff]  ;;  %v973_v17 = vpack.c.bf16 %v165_v13, %v163_v12  ;;  %v314_v20 = vld [vmem:[#allocation6 + $0x188] sm:$0xff]  ;;  %v167_v21 = vld [vmem:[%s2009_s2 + $0x180] sm:$0xff] }
  0x7e   :  { %1006 = vmatpush1.bf16.msra.mxu1 %v1005_v36  ;;  %v1021_v18 = vpack.c.bf16 %v311_v16, %v309_v15  ;;  %v1698_v22 = vld [vmem:[%s2007_s0] sm:$0xff]  ;;  %v1705_v25 = vld [vmem:[%s2007_s0 + $0x18] sm:$0xff]  ;;  %v1716_v27 = vld [vmem:[%s2007_s0 + $0x10] sm:$0xff] }
  0x7f   :  { %1008 = vmatprep.subr.bf16.mxu1 %v1007_v41  ;;  %v313_v23 = vld [vmem:[#allocation6 + $0x180] sm:$0xff]  ;;  %v1707_v26 = vld [vmem:[#allocation3 + $0x18] sm:$0xff]  ;;  %v1720_v28 = vld [vmem:[#allocation3 + $0x10] sm:$0xff] }
  0x80   :  { %962 = vmatpush1.bf16.msra.mxu0 %v961_v47  ;;  %v1700_v24 = vld [vmem:[#allocation3] sm:$0xff]  ;;  %v512_v29 = vld [vmem:[#allocation8 + $0x8] sm:$0xff]  ;;  %v514_v30 = vld [vmem:[#allocation8 + $0x18] sm:$0xff] }
  0x81   :  { %964 = vmatprep.subr.bf16.mxu0 %v963_v51  ;;  %v511_v31 = vld [vmem:[#allocation8] sm:$0xff]  ;;  %v1023_v32 = vpack.c.bf16 %v514_v30, %v512_v29  ;;  %v513_v33 = vld [vmem:[#allocation8 + $0x10] sm:$0xff]  ;;  %v516_v34 = vld [vmem:[#allocation8 + $0x28] sm:$0xff] }
  0x82   :  { %1010 = vmatpush1.bf16.msra.mxu1 %v1009_v50  ;;  %v518_v35 = vld [vmem:[#allocation8 + $0x38] sm:$0xff]  ;;  %v1025_v36 = vpack.c.bf16 %v513_v33, %v511_v31  ;;  %v515_v38 = vld [vmem:[#allocation8 + $0x20] sm:$0xff]  ;;  %v517_v39 = vld [vmem:[#allocation8 + $0x30] sm:$0xff] }
  0x83   :  { %1012 = vmatprep.subr.bf16.mxu1 %v1011_v55  ;;  %v1027_v37 = vpack.c.bf16 %v518_v35, %v516_v34  ;;  %v520_v40 = vld [vmem:[#allocation8 + $0x48] sm:$0xff]  ;;  %v522_v41 = vld [vmem:[#allocation8 + $0x58] sm:$0xff]  ;;  %v1029_v42 = vpack.c.bf16 %v517_v39, %v515_v38  ;;  %v519_v44 = vld [vmem:[#allocation8 + $0x40] sm:$0xff] }
  0x84   :  { %966 = vmatpush1.bf16.msra.mxu0 %v965_v61  ;;  %v1031_v43 = vpack.c.bf16 %v522_v41, %v520_v40  ;;  %v521_v45 = vld [vmem:[#allocation8 + $0x50] sm:$0xff]  ;;  %v524_v46 = vld [vmem:[#allocation8 + $0x68] sm:$0xff]  ;;  %v526_v47 = vld [vmem:[#allocation8 + $0x78] sm:$0xff] }
  0x85   :  { %968 = vmatprep.subr.bf16.mxu0 %v967_v63  ;;  %v1033_v48 = vpack.c.bf16 %v521_v45, %v519_v44  ;;  %v523_v50 = vld [vmem:[#allocation8 + $0x60] sm:$0xff]  ;;  %v525_v51 = vld [vmem:[#allocation8 + $0x70] sm:$0xff]  ;;  %v528_v52 = vld [vmem:[#allocation8 + $0x88] sm:$0xff] }
  0x86   :  { %1014 = vmatpush1.bf16.msra.mxu1 %v1013_v62  ;;  %v530_v53 = vld [vmem:[#allocation8 + $0x98] sm:$0xff]  ;;  %v1037_v54 = vpack.c.bf16 %v525_v51, %v523_v50  ;;  %v527_v56 = vld [vmem:[#allocation8 + $0x80] sm:$0xff]  ;;  %v529_v57 = vld [vmem:[#allocation8 + $0x90] sm:$0xff] }
  0x87   :  { %1016 = vmatprep.subr.bf16.mxu1 %v1015_v3  ;;  %v1039_v55 = vpack.c.bf16 %v530_v53, %v528_v52  ;;  %v532_v59 = vld [vmem:[#allocation8 + $0xa8] sm:$0xff]  ;;  %v534_v60 = vld [vmem:[#allocation8 + $0xb8] sm:$0xff]  ;;  %v1041_v61 = vpack.c.bf16 %v529_v57, %v527_v56  ;;  %v531_v63 = vld [vmem:[#allocation8 + $0xa0] sm:$0xff] }
  0x88   :  { %970 = vmatpush1.bf16.msra.mxu0 %v969_v9  ;;  %v1043_v62 = vpack.c.bf16 %v534_v60, %v532_v59  ;;  %v533_v0 = vld [vmem:[#allocation8 + $0xb0] sm:$0xff]  ;;  %v536_v1 = vld [vmem:[#allocation8 + $0xc8] sm:$0xff]  ;;  %v538_v2 = vld [vmem:[#allocation8 + $0xd8] sm:$0xff] }
  0x89   :  { %972 = vmatprep.subr.bf16.mxu0 %v971_v11  ;;  %v1045_v3 = vpack.c.bf16 %v533_v0, %v531_v63  ;;  %v1047_v4 = vpack.c.bf16 %v538_v2, %v536_v1  ;;  %v535_v5 = vld [vmem:[#allocation8 + $0xc0] sm:$0xff]  ;;  %v537_v6 = vld [vmem:[#allocation8 + $0xd0] sm:$0xff]  ;;  %v540_v7 = vld [vmem:[#allocation8 + $0xe8] sm:$0xff] }
  0x8a   :  { %1018 = vmatpush1.bf16.msra.mxu1 %v1017_v10  ;;  %v542_v8 = vld [vmem:[#allocation8 + $0xf8] sm:$0xff]  ;;  %v1049_v9 = vpack.c.bf16 %v537_v6, %v535_v5  ;;  %v539_v11 = vld [vmem:[#allocation8 + $0xe0] sm:$0xff]  ;;  %v541_v12 = vld [vmem:[#allocation8 + $0xf0] sm:$0xff] }
  0x8b   :  { %1020 = vmatprep.subr.bf16.mxu1 %v1019_v14  ;;  %v1051_v10 = vpack.c.bf16 %v542_v8, %v540_v7  ;;  %v544_v13 = vld [vmem:[#allocation8 + $0x108] sm:$0xff]  ;;  %v546_v14 = vld [vmem:[#allocation8 + $0x118] sm:$0xff]  ;;  %v1053_v15 = vpack.c.bf16 %v541_v12, %v539_v11  ;;  %v547_v29 = vld [vmem:[#allocation8 + $0x120] sm:$0xff] }
  0x8c   :  { %974 = vmatpush1.bf16.msra.mxu0 %v973_v17  ;;  %v1055_v16 = vpack.c.bf16 %v546_v14, %v544_v13  ;;  %v543_v17 = vld [vmem:[#allocation8 + $0x100] sm:$0xff]  ;;  %v549_v30 = vld [vmem:[#allocation8 + $0x130] sm:$0xff]  ;;  %v552_v31 = vld [vmem:[#allocation8 + $0x148] sm:$0xff] }
  0x8d   :  { %236 = vmatprep.subr.mxu0 %v168_v19  ;;  %v548_v19 = vld [vmem:[#allocation8 + $0x128] sm:$0xff]  ;;  %v1061_v33 = vpack.c.bf16 %v549_v30, %v547_v29  ;;  %v551_v35 = vld [vmem:[#allocation8 + $0x140] sm:$0xff]  ;;  %v558_v38 = vld [vmem:[#allocation8 + $0x178] sm:$0xff] }
  0x8e   :  { %1022 = vmatpush1.bf16.msra.mxu1 %v1021_v18  ;;  %v545_v18 = vld [vmem:[#allocation8 + $0x110] sm:$0xff]  ;;  %v555_v41 = vld [vmem:[#allocation8 + $0x160] sm:$0xff]  ;;  %v560_v44 = vld [vmem:[#allocation8 + $0x188] sm:$0xff] }
  0x8f   :  { %369 = vmatprep.subr.mxu1 %v314_v20  ;;  %v550_v20 = vld [vmem:[#allocation8 + $0x138] sm:$0xff]  ;;  %v559_v45 = vld [vmem:[#allocation8 + $0x180] sm:$0xff]  ;;  %v462_v29 = vld [vmem:[#allocation11] sm:$0x3] }
  0x90   :  { %237 = vmatpush1.msra.mxu0 %v167_v21  ;;  %v1057_v21 = vpack.c.bf16 %v545_v18, %v543_v17 }
  0x91   :  { %253 = vmatmul.mubr.f32.vlgmr.msra.gmra.mrb[0].mxu0 %v1698_v22  ;;  %1024 = vmatprep.subr.bf16.mxu0 %v1023_v32  ;;  %v554_v32 = vld [vmem:[#allocation8 + $0x158] sm:$0xff] }
  0x92   :  { %370 = vmatpush1.msra.mxu1 %v313_v23  ;;  %906 = vmatprep.mubr.msk.f32.mxu0 %vm181_vm0, %v1705_v25  ;;  %v1059_v23 = vpack.c.bf16 %v550_v20, %v548_v19  ;;  %v1063_v34 = vpack.c.bf16 %v554_v32, %v552_v31 }
  0x93   :  { %386 = vmatmul.mubr.f32.vlgmr.msra.gmra.mrb[0].mxu1 %v1700_v24  ;;  %1026 = vmatpush1.bf16.msra.mxu0 %v1025_v36  ;;  %v553_v36 = vld [vmem:[#allocation8 + $0x150] sm:$0xff] }
  0x94   :  { %908 = vmatprep.mubr.msk.f32.mxu1 %vm181_vm0, %v1707_v26  ;;  %1028 = vmatprep.subr.bf16.mxu0 %v1027_v37  ;;  %v556_v37 = vld [vmem:[#allocation8 + $0x168] sm:$0xff]  ;;  %v1065_v39 = vpack.c.bf16 %v553_v36, %v551_v35 }
  0x95   :  { %259 = vmatmul.mubr.f32.gmra.mrb[2].mxu0 %v1716_v27  ;;  %v1067_v40 = vpack.c.bf16 %v558_v38, %v556_v37 }
  0x96   :  { %920 = vmatprep.mubr.msk.f32.mxu0 %vm181_vm0, %v1654_v49  ;;  %v1035_v49 = vpack.c.bf16 %v526_v47, %v524_v46  ;;  %v171_v46 = vlaneseq }
  0x97   :  { %392 = vmatmul.mubr.f32.gmra.mrb[2].mxu1 %v1720_v28  ;;  %1030 = vmatpush1.bf16.msra.mxu0 %v1029_v42  ;;  %v557_v42 = vld [vmem:[#allocation8 + $0x170] sm:$0xff] }
  0x98   :  { %1032 = vmatprep.subr.bf16.mxu0 %v1031_v43  ;;  %v1069_v43 = vpack.c.bf16 %v557_v42, %v555_v41  ;;  %v172_v47 = vshrl.u32 %v171_v46, 7 }
  0x9a   :  { %v1737_v50 = vsub.s32 1, %v172_v47 }
  0x9b   :  { %1034 = vmatpush1.bf16.msra.mxu0 %v1033_v48  ;;  %v1732_v48 = vsub.s32 0, %v172_v47 }
  0x9c   :  { %1036 = vmatprep.subr.bf16.mxu0 %v1035_v49  ;;  %v169_v49 = vld [vmem:[%s2010_s3] sm:$0x3]  ;;  %v471_v32 = vrot.slane %v462_v29, %v1737_v50 }
  0x9d   :  { %v178_v51 = vrot.slane %v169_v49, %v1737_v50  ;;  %v467_v31 = vrot.slane %v462_v29, %v1732_v48 }
  0x9f   :  { %1038 = vmatpush1.bf16.msra.mxu0 %v1037_v54 }
  0xa0   :  { %1040 = vmatprep.subr.bf16.mxu0 %v1039_v55 }
  0xa3   :  { %1042 = vmatpush1.bf16.msra.mxu0 %v1041_v61 }
  0xa4   :  { %1044 = vmatprep.subr.bf16.mxu0 %v1043_v62 }
  0xa7   :  { %1046 = vmatpush1.bf16.msra.mxu0 %v1045_v3 }
  0xa8   :  { %1048 = vmatprep.subr.bf16.mxu0 %v1047_v4 }
  0xab   :  { %1050 = vmatpush1.bf16.msra.mxu0 %v1049_v9 }
  0xac   :  { %1052 = vmatprep.subr.bf16.mxu0 %v1051_v10 }
  0xaf   :  { %1054 = vmatpush1.bf16.msra.mxu0 %v1053_v15 }
  0xb0   :  { %1056 = vmatprep.subr.bf16.mxu0 %v1055_v16 }
  0xb3   :  { %1058 = vmatpush1.bf16.msra.mxu0 %v1057_v21  ;;  %v446_v21 = vld [vmem:[#allocation9] sm:$0x3] }
  0xb4   :  { %1060 = vmatprep.subr.bf16.mxu0 %v1059_v23  ;;  %v451_v30 = vrot.slane %v446_v21, %v1732_v48 }
  0xb7   :  { %1062 = vmatpush1.bf16.msra.mxu0 %v1061_v33 }
  0xb8   :  { %1064 = vmatprep.subr.bf16.mxu0 %v1063_v34  ;;  %v455_v34 = vrot.slane %v446_v21, %v1737_v50  ;;  %v676_v21 = vld [vmem:[%s2017_s10 + $0x40] sm:$0xff] }
  0xbb   :  { %1066 = vmatpush1.bf16.msra.mxu0 %v1065_v39 }
  0xbc   :  { %1068 = vmatprep.subr.bf16.mxu0 %v1067_v40 }
  0xbf   :  { %1070 = vmatpush1.bf16.msra.mxu0 %v1069_v43 }
  0xc0   :  { %621 = vmatprep.subr.mxu0 %v560_v44 }
  0xc3   :  { %622 = vmatpush1.msra.mxu0 %v559_v45 }
  0xc4   :  { %638 = vmatmul.mubr.f32.vlgmr.msra.gmra.mrb[4].mxu0 %v1698_v22  ;;  %v174_v22 = vrot.slane %v169_v49, %v1732_v48 }
  0xc5   :  { %921 = vmatprep.mubr.msk.f32.mxu0 %vm181_vm0, %v1705_v25 }
  0xc8   :  { %644 = vmatmul.mubr.f32.gmra.mrb[6].mxu0 %v1716_v27 }
  0xc9   :  { %924 = vmatprep.mubr.msk.f32.mxu0 %vm181_vm0, %v1667_v58 }
 0x164   :  { %v254_v25 = vpop.f32.mrb[0].mxu0 }
 0x165   :  { %v255_v52 = vadd.f32 %v254_v25, %v174_v22  ;;  %v256_v27 = vpop.f32.mrb[1].mxu0 }
 0x166   :  { %v387_v53 = vpop.f32.mrb[0].mxu1  ;;  %v257_v54 = vadd.f32 %v256_v27, %v178_v51 }
 0x167   :  { %v909_v58 = vmul.f32 -1.442695, %v387_v53  ;;  %v389_v55 = vpop.f32.mrb[1].mxu1  ;;  %v913_v56 = vmul.f32 -1.442695, %v255_v52 }
 0x168   :  { %v910_v57 = vmul.f32 -1.442695, %v389_v55  ;;  %v914_v59 = vmul.f32 -1.442695, %v257_v54  ;;  %v260_v60 = vpop.f32.mrb[2].mxu0 }
 0x169   :  { %1184 = vpow2.f32 %v909_v58  ;;  %v261_v61 = vadd.f32 %v260_v60, %v174_v22  ;;  %v262_v62 = vpop.f32.mrb[3].mxu0  ;;  %v668_v60 = vld [vmem:[%s2017_s10] sm:$0xff] }
 0x16a   :  { %1186 = vpow2.f32 %v913_v56  ;;  %v393_v63 = vpop.f32.mrb[2].mxu1  ;;  %v263_v0 = vadd.f32 %v262_v62, %v178_v51  ;;  %v1379_v56 = vmov 0  }
 0x16b   :  { %1188 = vpow2.f32 %v914_v59  ;;  %v911_v1 = vmul.f32 -1.442695, %v393_v63  ;;  %v395_v2 = vpop.f32.mrb[3].mxu1  ;;  %v915_v3 = vmul.f32 -1.442695, %v261_v61  ;;  %1182 = vset.pattern.permute.xlu1 %v1379_v56  ;;  %1183 = vset.pattern.permute.xlu0 %v1379_v56  ;;  %v694_v59 = vld [vmem:[%s2018_s11 + $0x8] sm:$0xff] }
 0x16c   :  { %1190 = vpow2.f32 %v910_v57  ;;  %v912_v4 = vmul.f32 -1.442695, %v395_v2  ;;  %v916_v5 = vmul.f32 -1.442695, %v263_v0  ;;  %v693_v57 = vld [vmem:[%s2018_s11] sm:$0xff]  ;;  %v1380_v61 = vmov 0.0|0.0  }
 0x16d   :  { %1192 = vpow2.f32 %v911_v1  ;;  %1071 = vmatprep.subr.bf16.mxu1 %v1380_v61  ;;  %v1072_v62 = vpack.c.bf16 %v694_v59, %v693_v57  ;;  %1107 = vmatprep.subr.bf16.mxu0 %v1380_v61  ;;  %v669_v63 = vld [vmem:[%s2017_s10 + $0x8] sm:$0xff]  ;;  %v695_v0 = vld [vmem:[%s2018_s11 + $0x10] sm:$0xff]  ;;  %v696_v1 = vld [vmem:[%s2018_s11 + $0x18] sm:$0xff] }
 0x16e   :  { %1194 = vpow2.f32 %v915_v3  ;;  %v1767_v2 = vpack.c.bf16 %v669_v63, %v668_v60  ;;  %v670_v3 = vld [vmem:[%s2017_s10 + $0x10] sm:$0xff]  ;;  %v687_v56 = vld [vmem:[%s2017_s10 + $0x98] sm:$0xff]  ;;  %v713_v60 = vld [vmem:[%s2018_s11 + $0xa0] sm:$0xff] }
 0x16f   :  { %1196 = vpow2.f32 %v916_v5  ;;  %1073 = vmatpush1.bf16.msra.mxu1 %v1072_v62  ;;  %v1075_v5 = vpack.c.bf16 %v696_v1, %v695_v0  ;;  %v714_v62 = vld [vmem:[%s2018_s11 + $0xa8] sm:$0xff]  ;;  %v688_v63 = vld [vmem:[%s2017_s10 + $0xa0] sm:$0xff] }
 0x170   :  { %1198 = vpow2.f32 %v912_v4  ;;  %v671_v4 = vld [vmem:[%s2017_s10 + $0x18] sm:$0xff]  ;;  %1109 = vmatpush1.bf16.msra.mxu0 %v1767_v2  ;;  %1074 = vmatprep.subr.bf16.mxu1 %v1380_v61  ;;  %v689_v0 = vld [vmem:[%s2017_s10 + $0xa8] sm:$0xff]  ;;  %v1102_v1 = vpack.c.bf16 %v714_v62, %v713_v60 }
 0x171   :  { %1110 = vmatprep.subr.bf16.mxu0 %v1380_v61 }
 0x173   :  { %v1185_v6 = vpop.eup %1184  ;;  %1076 = vmatpush1.bf16.msra.mxu1 %v1075_v5  ;;  %v716_v5 = vld [vmem:[%s2018_s11 + $0xb8] sm:$0xff] }
 0x174   :  { %v1187_v7 = vpop.eup %1186  ;;  %v410_v8 = vadd.f32 1.0, %v1185_v6  ;;  %v1777_v6 = vpack.c.bf16 %v671_v4, %v670_v3  ;;  %1077 = vmatprep.subr.bf16.mxu1 %v1380_v61  ;;  %v1930_v3 = vpack.c.bf16 %v689_v0, %v688_v63  ;;  %v715_v4 = vld [vmem:[%s2018_s11 + $0xb0] sm:$0xff] }
 0x175   :  { %v1189_v9 = vpop.eup %1188  ;;  %v434_v10 = vadd.f32 1.0, %v1187_v7  ;;  %v697_v7 = vld [vmem:[%s2018_s11 + $0x20] sm:$0xff] }
 0x176   :  { %v1191_v11 = vpop.eup %1190  ;;  %v435_v12 = vadd.f32 1.0, %v1189_v9  ;;  %1200 = vrcp.f32 %v410_v8  ;;  %v698_v8 = vld [vmem:[%s2018_s11 + $0x28] sm:$0xff]  ;;  %v672_v9 = vld [vmem:[%s2017_s10 + $0x20] sm:$0xff]  ;;  %1112 = vmatpush1.bf16.msra.mxu0 %v1777_v6 }
 0x177   :  { %v1193_v13 = vpop.eup %1192  ;;  %1202 = vrcp.f32 %v434_v10  ;;  %v411_v14 = vadd.f32 1.0, %v1191_v11  ;;  %v673_v10 = vld [vmem:[%s2017_s10 + $0x28] sm:$0xff]  ;;  %v1078_v11 = vpack.c.bf16 %v698_v8, %v697_v7  ;;  %1113 = vmatprep.subr.bf16.mxu0 %v1380_v61  ;;  %v690_v7 = vld [vmem:[%s2017_s10 + $0xb0] sm:$0xff]  ;;  %v691_v8 = vld [vmem:[%s2017_s10 + $0xb8] sm:$0xff] }
 0x178   :  { %v1195_v15 = vpop.eup %1194  ;;  %1204 = vrcp.f32 %v435_v12  ;;  %v412_v16 = vadd.f32 1.0, %v1193_v13  ;;  %v1794_v12 = vpack.c.bf16 %v673_v10, %v672_v9  ;;  %v699_v13 = vld [vmem:[%s2018_s11 + $0x30] sm:$0xff]  ;;  %v1105_v9 = vpack.c.bf16 %v716_v5, %v715_v4 }
 0x179   :  { %v1197_v17 = vpop.eup %1196  ;;  %1206 = vrcp.f32 %v411_v14  ;;  %v436_v18 = vadd.f32 1.0, %v1195_v15  ;;  %v700_v14 = vld [vmem:[%s2018_s11 + $0x38] sm:$0xff]  ;;  %v674_v15 = vld [vmem:[%s2017_s10 + $0x30] sm:$0xff]  ;;  %1079 = vmatpush1.bf16.msra.mxu1 %v1078_v11  ;;  %v1947_v10 = vpack.c.bf16 %v691_v8, %v690_v7  ;;  %v917_v11 = vld [vmem:[#allocation2] ss:$0 sm:$0xff] }
 0x17a   :  { %v1199_v19 = vpop.eup %1198  ;;  %v437_v20 = vadd.f32 1.0, %v1197_v17  ;;  %1208 = vrcp.f32 %v412_v16  ;;  %v675_v16 = vld [vmem:[%s2017_s10 + $0x38] sm:$0xff]  ;;  %v1081_v17 = vpack.c.bf16 %v700_v14, %v699_v13  ;;  %1115 = vmatpush1.bf16.msra.mxu0 %v1794_v12  ;;  %1080 = vmatprep.subr.bf16.mxu1 %v1380_v61 }
 0x17b   :  { %1210 = vrcp.f32 %v436_v18  ;;  %v413_v23 = vadd.f32 1.0, %v1199_v19  ;;  %v1811_v18 = vpack.c.bf16 %v675_v16, %v674_v15  ;;  %v701_v19 = vld [vmem:[%s2018_s11 + $0x40] sm:$0xff]  ;;  %1116 = vmatprep.subr.bf16.mxu0 %v1380_v61 }
 0x17c   :  { %1212 = vrcp.f32 %v437_v20  ;;  %v702_v20 = vld [vmem:[%s2018_s11 + $0x48] sm:$0xff] }
 0x17d   :  { %1214 = vrcp.f32 %v413_v23  ;;  %v677_v23 = vld [vmem:[%s2017_s10 + $0x48] sm:$0xff]  ;;  %1082 = vmatpush1.bf16.msra.mxu1 %v1081_v17  ;;  %v1084_v29 = vpack.c.bf16 %v702_v20, %v701_v19 }
 0x17e   :  { %1118 = vmatpush1.bf16.msra.mxu0 %v1811_v18  ;;  %1083 = vmatprep.subr.bf16.mxu1 %v1380_v61 }
 0x17f   :  { %1119 = vmatprep.subr.bf16.mxu0 %v1380_v61 }
 0x180   :  { %v1201_v33 = vpop.eup %1200 }
 0x181   :  { %v1203_v35 = vpop.eup %1202  ;;  %v458_v36 = vmul.f32 %v1201_v33, %v451_v30  ;;  %v678_v33 = vld [vmem:[%s2017_s10 + $0x50] sm:$0xff]  ;;  %1085 = vmatpush1.bf16.msra.mxu1 %v1084_v29 }
 0x182   :  { %v1205_v37 = vpop.eup %1204  ;;  %v474_v38 = vmul.f32 %v1203_v35, %v467_v31  ;;  %1086 = vmatprep.subr.bf16.mxu1 %v1380_v61 }
 0x183   :  { %v1207_v39 = vpop.eup %1206  ;;  %v475_v40 = vmul.f32 %v1205_v37, %v471_v32  ;;  %v705_v37 = vld [vmem:[%s2018_s11 + $0x60] sm:$0xff] }
 0x184   :  { %v1209_v41 = vpop.eup %1208  ;;  %v459_v42 = vmul.f32 %v1207_v39, %v455_v34  ;;  %v478_v43 = vadd.f32 %v474_v38, %v458_v36  ;;  %v706_v38 = vld [vmem:[%s2018_s11 + $0x68] sm:$0xff]  ;;  %v680_v39 = vld [vmem:[%s2017_s10 + $0x60] sm:$0xff] }
 0x185   :  { %v1211_v44 = vpop.eup %1210  ;;  %v460_v45 = vmul.f32 %v1209_v41, %v451_v30  ;;  %v1828_v30 = vpack.c.bf16 %v677_v23, %v676_v21  ;;  %v1090_v41 = vpack.c.bf16 %v706_v38, %v705_v37  ;;  %v717_v37 = vld [vmem:[%s2018_s11 + $0xc0] sm:$0xff]  ;;  %v1381_v38 = vmov 0.0  }
 0x186   :  { %v1213_v46 = vpop.eup %1212  ;;  %v479_v47 = vadd.f32 %v475_v40, %v459_v42  ;;  %v476_v49 = vmul.f32 %v1211_v44, %v467_v31  ;;  %v703_v31 = vld [vmem:[%s2018_s11 + $0x50] sm:$0xff]  ;;  %v681_v40 = vld [vmem:[%s2017_s10 + $0x68] sm:$0xff]  ;;  %v708_v44 = vld [vmem:[%s2018_s11 + $0x78] sm:$0xff] }
 0x187   :  { %v1215_v22 = vpop.eup %1214  ;;  %v477_v51 = vmul.f32 %v1213_v46, %v471_v32  ;;  %v704_v32 = vld [vmem:[%s2018_s11 + $0x58] sm:$0xff]  ;;  %1121 = vmatpush1.bf16.msra.mxu0 %v1828_v30  ;;  %v1862_v42 = vpack.c.bf16 %v681_v40, %v680_v39  ;;  %v692_v39 = vld [vmem:[%s2017_s10 + $0xc0] sm:$0xff] }
 0x188   :  { %v482_v25 = vsel %vm181_vm0, %v479_v47, 0.0  ;;  %v461_v52 = vmul.f32 %v1215_v22, %v455_v34  ;;  %v480_v27 = vadd.f32 %v476_v49, %v460_v45  ;;  %v679_v34 = vld [vmem:[%s2017_s10 + $0x58] sm:$0xff]  ;;  %v1087_v35 = vpack.c.bf16 %v704_v32, %v703_v31  ;;  %1122 = vmatprep.subr.bf16.mxu0 %v1380_v61  ;;  %v682_v45 = vld [vmem:[%s2017_s10 + $0x70] sm:$0xff]  ;;  %v709_v22 = vld [vmem:[%s2018_s11 + $0x80] sm:$0xff] }
 0x189   :  { %v483_v53 = vadd.f32 %v482_v25, %v478_v43  ;;  %v1845_v36 = vpack.c.bf16 %v679_v34, %v678_v33  ;;  %v707_v43 = vld [vmem:[%s2018_s11 + $0x70] sm:$0xff]  ;;  %v683_v46 = vld [vmem:[%s2017_s10 + $0x78] sm:$0xff]  ;;  %v684_v25 = vld [vmem:[%s2017_s10 + $0x80] sm:$0xff] }
 0x18a   :  { %v481_v54 = vadd.f32 %v477_v51, %v461_v52  ;;  %1088 = vmatpush1.bf16.msra.mxu1 %v1087_v35  ;;  %v1093_v47 = vpack.c.bf16 %v708_v44, %v707_v43  ;;  %v1879_v49 = vpack.c.bf16 %v683_v46, %v682_v45  ;;  %v710_v51 = vld [vmem:[%s2018_s11 + $0x88] sm:$0xff] }
 0x18b   :  { %484 = vadd.xlane.f32.xlu0 %v483_v53  ;;  %1124 = vmatpush1.bf16.msra.mxu0 %v1845_v36  ;;  %v685_v52 = vld [vmem:[%s2017_s10 + $0x88] sm:$0xff] }
 0x18c   :  { %v486_v58 = vsel %vm181_vm0, %v481_v54, 0.0  ;;  %1089 = vmatprep.subr.bf16.mxu1 %v1380_v61  ;;  %1125 = vmatprep.subr.bf16.mxu0 %v1380_v61  ;;  %v1896_v53 = vpack.c.bf16 %v685_v52, %v684_v25  ;;  %v711_v54 = vld [vmem:[%s2018_s11 + $0x90] sm:$0xff] }
 0x18d   :  { %v487_v55 = vadd.f32 %v486_v58, %v480_v27  ;;  %v1096_v27 = vpack.c.bf16 %v710_v51, %v709_v22  ;;  %v712_v58 = vld [vmem:[%s2018_s11 + $0x98] sm:$0xff]  ;;  %s1382_s11 = smov [#allocation12]  }
 0x18e   :  { %1091 = vmatpush1.bf16.msra.mxu1 %v1090_v41  ;;  %v1099_v57 = vpack.c.bf16 %v712_v58, %v711_v54  ;;  %v561_v41 = vld [vmem:[%s2013_s6] sm:$0x3]  ;;  %s891_s0 = sshll.u32 %s1382_s11, 4  ;;  %s892_s0 = int_to_ptr.vmem [resolvable:$true] %s891_s0 }
 0x18f   :  { %488 = vadd.xlane.f32.xlu0 %v487_v55  ;;  %1127 = vmatpush1.bf16.msra.mxu0 %v1862_v42  ;;  %v686_v55 = vld [vmem:[%s2017_s10 + $0x90] sm:$0xff]  ;;  %v566_v43 = vrot.slane %v561_v41, %v1732_v48  ;;  %v570_v44 = vrot.slane %v561_v41, %v1737_v50  ;;  %s1342_s14 = scalar_lea.vmem %s892_s0, 256  ;;  %p1347_p13 = scmp.lt.s32.totalorder %s892_s0, %s892_s0 }
 0x190   :  { %1092 = vmatprep.subr.bf16.mxu1 %v1380_v61  ;;  %1128 = vmatprep.subr.bf16.mxu0 %v1380_v61  ;;  %v1913_v59 = vpack.c.bf16 %v687_v56, %v686_v55  ;;  %p1343_p12 = scmp.ne.s32.totalorder %s892_s0, %s1342_s14  ;;  %p1348_p0 = scmp.lt.s32.totalorder %s1342_s14, %s1342_s14 }
 0x192   :  { %1094 = vmatpush1.bf16.msra.mxu1 %v1093_v47  ;;  %p1349_p1 = por %p1348_p0, %p1347_p13 }
 0x193   :  { %1130 = vmatpush1.bf16.msra.mxu0 %v1879_v49  ;;  %1095 = vmatprep.subr.bf16.mxu1 %v1380_v61 }
 0x194   :  { %1131 = vmatprep.subr.bf16.mxu0 %v1380_v61  ;;  %p1350_p2 = pnand %p1349_p1, %p1343_p12 }
 0x196   :  { %1097 = vmatpush1.bf16.msra.mxu1 %v1096_v27 }
 0x197   :  { %1133 = vmatpush1.bf16.msra.mxu0 %v1896_v53  ;;  %1098 = vmatprep.subr.bf16.mxu1 %v1380_v61  ;;  %v639_v13 = vpop.f32.mrb[4].mxu0 }
 0x198   :  { %1134 = vmatprep.subr.bf16.mxu0 %v1380_v61  ;;  %v641_v15 = vpop.f32.mrb[5].mxu0  ;;  %v640_v45 = vadd.f32 %v639_v13, %v566_v43 }
 0x199   :  { %v642_v46 = vadd.f32 %v641_v15, %v570_v44 }
 0x19a   :  { %1100 = vmatpush1.bf16.msra.mxu1 %v1099_v57 }
 0x19b   :  { %1136 = vmatpush1.bf16.msra.mxu0 %v1913_v59  ;;  %1101 = vmatprep.subr.bf16.mxu1 %v1380_v61  ;;  %v645_v19 = vpop.f32.mrb[6].mxu0 }
 0x19c   :  { %1137 = vmatprep.subr.bf16.mxu0 %v1380_v61  ;;  %v647_v21 = vpop.f32.mrb[7].mxu0  ;;  %v646_v47 = vadd.f32 %v645_v19, %v566_v43 }
 0x19d   :  { %v648_v22 = vadd.f32 %v647_v21, %v570_v44 }
 0x19e   :  { %1103 = vmatpush1.bf16.msra.mxu1 %v1102_v1 }
 0x19f   :  { %1139 = vmatpush1.bf16.msra.mxu0 %v1930_v3  ;;  %1104 = vmatprep.subr.bf16.mxu1 %v1380_v61 }
 0x1a0   :  { %1140 = vmatprep.subr.bf16.mxu0 %v1380_v61 }
 0x1a2   :  { %1106 = vmatpush1.bf16.msra.mxu1 %v1105_v9 }
 0x1a3   :  { %1142 = vmatpush1.bf16.msra.mxu0 %v1947_v10  ;;  %772 = vmatprep.subr.mxu1 %v1381_v38 }
 0x1a4   :  { %847 = vmatprep.subr.mxu0 %v1381_v38 }
 0x1a6   :  { %773 = vmatpush1.msra.mxu1 %v717_v37 }
 0x1a7   :  { %1143 = vmatprep.subr.bf16.mxu1 %v1380_v61  ;;  %848 = vmatpush1.msra.mxu0 %v692_v39 }
 0x1a8   :  { %864 = vmatmul.mubr.f32.vlgmr.msra.gmra.mrb[8].mxu0 %v1700_v24 }
 0x218   :  { %v485_v14 = vpop.xlane.xlu0 %484 }
 0x219   :  { %v497_v16 = vadd.f32 %v917_v11, %v485_v14 }
 0x21b   :  { %v918_v17 = vmul.f32 -1.442695, %v497_v16 }
 0x21c   :  { %v489_v20 = vpop.xlane.xlu0 %488 }
 0x21d   :  { %1216 = vpow2.f32 %v918_v17  ;;  %v498_v23 = vadd.f32 %v917_v11, %v489_v20 }
 0x21f   :  { %v919_v29 = vmul.f32 -1.442695, %v498_v23 }
 0x221   :  { %1218 = vpow2.f32 %v919_v29 }
 0x227   :  { %v1217_v31 = vpop.eup %1216 }
 0x228   :  { %v505_v32 = vadd.f32 1.0, %v1217_v31 }
 0x22a   :  { %1220 = vrcp.f32 %v505_v32 }
 0x22b   :  { %v1219_v33 = vpop.eup %1218 }
 0x22c   :  { %v506_v34 = vadd.f32 1.0, %v1219_v33 }
 0x22e   :  { %1222 = vrcp.f32 %v506_v34 }
 0x22f   :  { %1224 = vtanh.f32 %v640_v45 }
 0x230   :  { %1226 = vtanh.f32 %v642_v46 }
 0x231   :  { %1228 = vtanh.f32 %v646_v47 }
 0x232   :  { %1230 = vtanh.f32 %v648_v22 }
 0x234   :  { %v1221_v35 = vpop.eup %1220 }
 0x235   :  { %656 = vperm.xlu1 %1182, %v1221_v35  }
 0x238   :  { %v1223_v40 = vpop.eup %1222 }
 0x239   :  { %661 = vperm.xlu1 %1182, %v1223_v40   ;;  %v1225_v51 = vpop.eup %1224 }
 0x23a   :  { %v1227_v25 = vpop.eup %1226 }
 0x23b   :  { %v1229_v24 = vpop.eup %1228 }
 0x23c   :  { %v1231_v58 = vpop.eup %1230 }
 0x2b4   :  { %v657_v52 = vpop.permute.xlu1 %656 }
 0x2b5   :  { %v664_v27 = vmul.f32 %v1225_v51, %v657_v52  ;;  %v665_v54 = vmul.f32 %v1227_v25, %v657_v52 }
 0x2b7   :  { %922 = vmatprep.mubr.msk.f32.mxu1 %vm181_vm0, %v665_v54 }
 0x2b8   :  { %789 = vmatmul.mubr.f32.vlgmr.msra.gmra.mrb[4].mxu1 %v664_v27  ;;  %v662_v48 = vpop.permute.xlu1 %661 }
 0x2b9   :  { %1156 = vmatpush1.bf16.msra.mxu1 %v1767_v2  ;;  %v666_v50 = vmul.f32 %v1229_v24, %v662_v48  ;;  %v667_v55 = vmul.f32 %v1231_v58, %v662_v48 }
 0x2ba   :  { %1144 = vmatprep.subr.bf16.mxu1 %v1380_v61 }
 0x2bb   :  { %923 = vmatprep.mubr.msk.f32.mxu1 %vm181_vm0, %v667_v55 }
 0x2bc   :  { %794 = vmatmul.mubr.f32.gmra.mrb[6].mxu1 %v666_v50 }
 0x2bd   :  { %1157 = vmatpush1.bf16.msra.mxu1 %v1777_v6  ;;  %925 = vmatprep.mubr.msk.f32.mxu1 %vm181_vm0, %v1707_v26  ;;  %v865_v26 = vpop.f32.mrb[8].mxu0 }
 0x2be   :  { %1145 = vmatprep.subr.bf16.mxu1 %v1380_v61  ;;  %v867_v2 = vpop.f32.mrb[9].mxu0 }
 0x2c1   :  { %1158 = vmatpush1.bf16.msra.mxu1 %v1794_v12  ;;  %v926_v12 = vld [vmem:[%s2019_s12] ss:$0 sm:$0xff] }
 0x2c2   :  { %1146 = vmatprep.subr.bf16.mxu1 %v1380_v61 }
 0x2c5   :  { %1159 = vmatpush1.bf16.msra.mxu1 %v1811_v18 }
 0x2c6   :  { %1147 = vmatprep.subr.bf16.mxu1 %v1380_v61 }
 0x2c9   :  { %1160 = vmatpush1.bf16.msra.mxu1 %v1828_v30 }
 0x2ca   :  { %1148 = vmatprep.subr.bf16.mxu1 %v1380_v61 }
 0x2cd   :  { %1161 = vmatpush1.bf16.msra.mxu1 %v1845_v36 }
 0x2ce   :  { %1149 = vmatprep.subr.bf16.mxu1 %v1380_v61 }
 0x2d1   :  { %1162 = vmatpush1.bf16.msra.mxu1 %v1862_v42 }
 0x2d2   :  { %1150 = vmatprep.subr.bf16.mxu1 %v1380_v61 }
 0x2d5   :  { %1163 = vmatpush1.bf16.msra.mxu1 %v1879_v49 }
 0x2d6   :  { %1151 = vmatprep.subr.bf16.mxu1 %v1380_v61 }
 0x2d9   :  { %1164 = vmatpush1.bf16.msra.mxu1 %v1896_v53 }
 0x2da   :  { %1152 = vmatprep.subr.bf16.mxu1 %v1380_v61 }
 0x2dd   :  { %1165 = vmatpush1.bf16.msra.mxu1 %v1913_v59 }
 0x2de   :  { %1153 = vmatprep.subr.bf16.mxu1 %v1380_v61 }
 0x2e1   :  { %1166 = vmatpush1.bf16.msra.mxu1 %v1930_v3 }
 0x2e2   :  { %1154 = vmatprep.subr.bf16.mxu1 %v1380_v61 }
 0x2e5   :  { %1167 = vmatpush1.bf16.msra.mxu1 %v1947_v10 }
 0x2e6   :  { %1155 = vmatprep.subr.mxu1 %v1381_v38 }
 0x2e9   :  { %1168 = vmatpush1.msra.mxu1 %v692_v39 }
 0x2ea   :  { %869 = vmatmul.mubr.f32.vlgmr.msra.gmra.mrb[8].mxu1 %v1720_v28 }
 0x38b   :  { %v790_v6 = vpop.f32.mrb[4].mxu1 }
 0x38c   :  { %v866_v18 = vadd.f32 %v865_v26, %v790_v6  ;;  %v792_v30 = vpop.f32.mrb[5].mxu1 }
 0x38e   :  { %v881_v36 = vadd.f32 %v926_v12, %v866_v18 }
 0x38f   :  { %v795_v42 = vpop.f32.mrb[6].mxu1 }
 0x390   :  { %884 = vst.msk [vmem:[#allocation12] sm:$0xff] %vm883_vm1, %v881_v36  ;;  %v797_v61 = vpop.f32.mrb[7].mxu1 }
 0x3bd   :  { %v870_v49 = vpop.f32.mrb[8].mxu1 }
 0x3be   :  { %v871_v53 = vadd.f32 %v870_v49, %v795_v42  ;;  %v872_v56 = vpop.f32.mrb[9].mxu1 }
 0x3c0   :  { %v882_v28 = vadd.f32 %v926_v12, %v871_v53 }
 0x3c2   :  { %885 = vst.msk [vmem:[#allocation12 + $0x8] sm:$0xff] %vm883_vm1, %v882_v28 }
 0x3c3   :  { %1353 = shalt.err (!%p1350_p2)
}
 0x3c4   :  { %s1354_s7 = scalar_lea.hbm %s2020_s13, 256 }
 0x3c5   :  { %p1355_p3 = scmp.ne.s32.totalorder %s2020_s13, %s1354_s7  ;;  %p1358_p4 = scmp.lt.u32.totalorder %s1354_s7, %s2020_s13 }
 0x3c7   :  { %p1360_p5 = pnand %p1358_p4, %p1355_p3 }
 0x3c9   :  { %1363 = shalt.err (!%p1360_p5)
}
 0x3ca   :  { %s1383_s5 = smov 128   ;;  %s1384_s21 = smov 8  }
 0x3cb   :  { %897 = dma.vmem_to_hbm [thread:$0]  %s892_s0, 256, %s2020_s13, [#allocation5], %s1383_s5, %s1383_s5, %s1384_s21  }
 0x3cc   :  { %1370 = dma.done.wait [#allocation5], 256  }
 0x3cd   :  { %1371 = vsyncadd [#allocation5], 4294967040 }
 0x3ce   :  { %901 = vsyncpa [#allocation4], 1 }
 0x3cf   :  { %902 = vsyncpa [#allocation7], 1 }
 0x3d0   :  { %903 = vsyncpa [#allocation10], 1 }
 0x3d1   :  { %904 = vsyncpa [#allocation5], 1 }

</bundles_post_ra>
